<compile_context>
chip_gen: v5e
topology: v5e:2x2
jax: 0.10.0
libtpu: 0.0.40
codegen_flags: <defaults>
</compile_context>

<pallas_src>
import functools

import jax
import jax.numpy as jnp
from jax.experimental import pallas as pl
from jax.experimental.pallas import tpu as pltpu

_LANE = 128      # lane width: every *output* feature dim is padded to a multiple of this
_SUBLANE = 8     # sublane width: f32 batch tile must be a multiple of this


def _round_up(n, m):
    return ((n + m - 1) // m) * m


# --------------------------------------------------------------------------- #
# Kernel                                                                      #
# --------------------------------------------------------------------------- #
def _mlp_kernel(num_layers, activation, x_ref, *refs):
    """Fused MLP forward for one batch tile.

    refs = (w0, b0, w1, b1, ..., w_{L-1}, b_{L-1}, o_ref).
    Matmuls hit the MXU with f32 accumulation (bf16 operands when the prepared
    params are bf16); bias add / ReLU run on the VPU, tanh on the EUP.
    Intermediate activations never leave vregs/VMEM.
    """
    o_ref = refs[-1]
    wb = refs[:-1]

    h = x_ref[...]                                    # f32 activations
    for l in range(num_layers):
        w = wb[2 * l][...]
        b = wb[2 * l + 1][...]                        # (1, out_pad) f32, broadcasts over batch
        lhs = h.astype(w.dtype) if w.dtype != h.dtype else h
        h = jnp.dot(lhs, w, preferred_element_type=jnp.float32) + b
        if l < num_layers - 1:
            if activation == "tanh":
                h = jnp.tanh(h)                       # EUP
            else:                                     # PyTorch module defaults to relu
                h = jnp.maximum(h, 0.0)               # VPU
    o_ref[...] = h.astype(o_ref.dtype)


# --------------------------------------------------------------------------- #
# One-time parameter preparation (do this once, reuse every forward call)     #
# --------------------------------------------------------------------------- #
def prepare_policy_params(params, param_dtype=jnp.bfloat16):
    """Pad/cast PolicyNetwork params once for the fused kernel.

    params = [(w, b), ...] with w shaped (in, out)  (transpose of torch's (out, in),
    so the kernel computes x @ W + b == torch's x @ W.T + b).

    Layer 0 keeps its UNPADDED contraction dim (matches the unpadded x block);
    every layer's output dim is zero-padded to a 128 multiple, and subsequent
    layers' input rows are zero-padded to match. Zero padding is exact:
    padded columns get zero weights + zero bias and ReLU(0)=tanh(0)=0.
    Biases stay f32 (post-matmul math is f32).
    """
    in_dim = params[0][0].shape[0]
    out_dim = params[-1][0].shape[1]
    layers = []
    prev_pad = in_dim                      # layer 0 contracts over the unpadded input dim
    for (w, b) in params:
        fi, fo = w.shape
        fo_pad = _round_up(fo, _LANE)
        w_p = jnp.pad(w.astype(jnp.float32),
                      ((0, prev_pad - fi), (0, fo_pad - fo))).astype(param_dtype)
        b_p = jnp.pad(b.astype(jnp.float32), (0, fo_pad - fo)).reshape(1, fo_pad)
        layers.append((w_p, b_p))
        prev_pad = fo_pad
    return {"layers": layers, "in_dim": in_dim, "out_dim": out_dim, "out_pad": prev_pad}


# --------------------------------------------------------------------------- #
# pallas_call construction                                                    #
# --------------------------------------------------------------------------- #
def _pick_batch_tile(batch):
    # Bigger tiles amortize the ~0.35us/grid-step overhead and fill the MXU M
    # dim on v6e/v7x; 256 keeps v5e (128x128 MXU) happy too and the x/out
    # tiles stay tiny vs VMEM.
    tb = min(256, _round_up(batch, _SUBLANE))
    # Keep >=2 grid steps whenever the batch allows it, so the "parallel" grid
    # axis can actually shard across v7x's two TensorCores.
    if _round_up(batch, tb) // tb < 2 and tb >= 2 * _SUBLANE:
        tb = _round_up(tb // 2, _SUBLANE)
    return tb


def _build_mlp_call(prep, activation, batch_pad, tb, single_buffer_weights):
    layers = prep["layers"]
    in_dim = prep["in_dim"]
    out_pad = prep["out_pad"]
    num_layers = len(layers)

    # x block: last dim == full array dim (in_dim), so the (8,128) rule is
    # satisfied without padding the feature axis -> no 8x padded-input DMA.
    in_specs = [pl.BlockSpec((tb, in_dim), lambda i: (i, 0))]

    def resident_spec(shape):
        # Block index never changes across the grid; single-buffer to avoid
        # paying 2x VMEM for weights that are never re-fetched.
        if single_buffer_weights:
            return pl.BlockSpec(shape, lambda i: (0, 0), pipeline_mode=pl.Buffered(1))
        return pl.BlockSpec(shape, lambda i: (0, 0))

    flops = 0
    transcendentals = 0
    bytes_accessed = batch_pad * in_dim * 4 + batch_pad * out_pad * 4
    resident_bytes = 0
    for li, (w_p, b_p) in enumerate(layers):
        in_specs.append(resident_spec(w_p.shape))
        in_specs.append(resident_spec(b_p.shape))
        flops += 2 * batch_pad * w_p.shape[0] * w_p.shape[1]
        if activation == "tanh" and li < num_layers - 1:
            transcendentals += batch_pad * w_p.shape[1]
        w_bytes = w_p.size * jnp.dtype(w_p.dtype).itemsize
        resident_bytes += w_bytes + b_p.size * 4
        bytes_accessed += w_bytes + b_p.size * 4

    # VMEM footprint: resident weights/biases (x2 if double-buffered) plus
    # double-buffered x/out tiles, with headroom; clamp to v7x's 64 MiB
    # physical and never below the 32 MiB default scoped limit.
    buf_factor = 1 if single_buffer_weights else 2
    tile_bytes = 2 * (tb * in_dim * 4 + tb * out_pad * 4)
    vmem_limit = int(1.5 * (buf_factor * resident_bytes + tile_bytes)) + (8 << 20)
    vmem_limit = min(max(vmem_limit, 32 << 20), 64 << 20)

    return pl.pallas_call(
        functools.partial(_mlp_kernel, num_layers, activation),
        out_shape=jax.ShapeDtypeStruct((batch_pad, out_pad), jnp.float32),
        grid=(batch_pad // tb,),
        in_specs=in_specs,
        out_specs=pl.BlockSpec((tb, out_pad), lambda i: (i, 0)),
        compiler_params=pltpu.CompilerParams(
            # batch tiles are independent -> megacore sharding on v7x
            dimension_semantics=("parallel",),
            vmem_limit_bytes=vmem_limit,
        ),
        cost_estimate=pl.CostEstimate(
            flops=flops,
            transcendentals=transcendentals,
            bytes_accessed=bytes_accessed,
        ),
    )


def policy_network_forward(prep, x, activation="relu"):
    """Mirrors PolicyNetwork.forward: hidden layers with activation, final
    layer linear (raw logits). `prep` comes from prepare_policy_params."""
    B, in_dim = x.shape
    assert in_dim == prep["in_dim"], (in_dim, prep["in_dim"])

    tb = _pick_batch_tile(B)
    b_pad = _round_up(B, tb)

    x = x.astype(jnp.float32)
    if b_pad != B:
        # Batch-only padding (feature dim stays unpadded); padded rows produce
        # activation(bias) garbage that is sliced off below.
        x = jnp.pad(x, ((0, b_pad - B), (0, 0)))

    flat_inputs = [x]
    for (w_p, b_p) in prep["layers"]:
        flat_inputs += [w_p, b_p]

    try:
        out = _build_mlp_call(prep, activation, b_pad, tb, True)(*flat_inputs)
    except Exception:
        # pipeline_mode=pl.Buffered(1) not supported in this environment; the
        # default double-buffered specs are semantically identical.
        out = _build_mlp_call(prep, activation, b_pad, tb, False)(*flat_inputs)

    return out[:B, :prep["out_dim"]]


# --------------------------------------------------------------------------- #
# Parameter init + pure-JAX reference                                         #
# --------------------------------------------------------------------------- #
def init_policy_params(key, input_dim, output_dim, hidden_dims):
    """Deterministic parameter init matching PyTorch nn.Linear's
    U(-1/sqrt(fan_in), 1/sqrt(fan_in)) scheme (synthetic, no checkpoint)."""
    dims = [input_dim] + list(hidden_dims) + [output_dim]
    params = []
    for i in range(len(dims) - 1):
        fan_in, fan_out = dims[i], dims[i + 1]
        key, kw, kb = jax.random.split(key, 3)
        bound = 1.0 / jnp.sqrt(jnp.float32(fan_in))
        # stored as (in, out): transpose of torch's (out, in) weight
        w = jax.random.uniform(kw, (fan_in, fan_out), jnp.float32, -bound, bound)
        b = jax.random.uniform(kb, (fan_out,), jnp.float32, -bound, bound)
        params.append((w, b))
    return params


def policy_network_reference(params, x, activation="relu"):
    """Pure-JAX reference for correctness checking (f32 everywhere)."""
    act = jnp.tanh if activation == "tanh" else (lambda v: jnp.maximum(v, 0.0))
    for (w, b) in params[:-1]:
        x = act(x @ w + b)
    w, b = params[-1]
    return x @ w + b


if __name__ == "__main__":
    # Small shapes consistent with an RL policy head:
    #   batch=2 observations of dim 16 -> hidden [32, 32] -> 8 action logits
    batch, input_dim, output_dim = 2, 16, 8
    hidden_dims = [32, 32]

    key = jax.random.PRNGKey(0)
    key, kx = jax.random.split(key)
    x = jax.random.normal(kx, (batch, input_dim), jnp.float32)
    params = init_policy_params(key, input_dim, output_dim, hidden_dims)

    ref_relu = policy_network_reference(params, x, "relu")
    ref_tanh = policy_network_reference(params, x, "tanh")

    # --- f32 param path: exact check against the pure-JAX reference ---------
    prep_f32 = prepare_policy_params(params, param_dtype=jnp.float32)
    out = jax.block_until_ready(policy_network_forward(prep_f32, x, "relu"))
    assert out.shape == (batch, output_dim), out.shape
    assert jnp.allclose(out, ref_relu, atol=1e-5, rtol=1e-5), "relu f32 mismatch vs reference"

    out_t = jax.block_until_ready(policy_network_forward(prep_f32, x, "tanh"))
    assert jnp.allclose(out_t, ref_tanh, atol=1e-5, rtol=1e-5), "tanh f32 mismatch vs reference"

    # --- bf16 param path (default production path): quantization tolerance --
    prep_bf16 = prepare_policy_params(params)          # param_dtype=bf16
    out_b = jax.block_until_ready(policy_network_forward(prep_bf16, x, "relu"))
    assert out_b.shape == (batch, output_dim), out_b.shape
    assert jnp.allclose(out_b, ref_relu, atol=5e-2, rtol=5e-2), "relu bf16 mismatch vs reference"

    print("KERNEL_OK")
</pallas_src>

<mosaic_0001>
module attributes {stable_mosaic.version = 11 : i64} {
  func.func @_mlp_kernel(%arg0: i32, %arg1: memref<8x16xf32, #tpu.memory_space<vmem>>, %arg2: memref<16x128xf32, #tpu.memory_space<vmem>>, %arg3: memref<1x128xf32, #tpu.memory_space<vmem>>, %arg4: memref<128x128xf32, #tpu.memory_space<vmem>>, %arg5: memref<1x128xf32, #tpu.memory_space<vmem>>, %arg6: memref<128x128xf32, #tpu.memory_space<vmem>>, %arg7: memref<1x128xf32, #tpu.memory_space<vmem>>, %arg8: memref<8x128xf32, #tpu.memory_space<vmem>>) attributes {dimension_semantics = [#tpu.dimension_semantics<parallel>], iteration_bounds = array<i64: 1>, scalar_prefetch = 0 : i64, scratch_operands = 0 : i64, tpu.core_type = #tpu.core_type<tc>, window_params = [{transform_indices = @transform_0, window_bounds = array<i64: 8, 16>}, {pipeline_mode = #tpu.pipeline_mode<synchronous>, transform_indices = @transform_1, window_bounds = array<i64: 16, 128>}, {pipeline_mode = #tpu.pipeline_mode<synchronous>, transform_indices = @transform_2, window_bounds = array<i64: 1, 128>}, {pipeline_mode = #tpu.pipeline_mode<synchronous>, transform_indices = @transform_3, window_bounds = array<i64: 128, 128>}, {pipeline_mode = #tpu.pipeline_mode<synchronous>, transform_indices = @transform_4, window_bounds = array<i64: 1, 128>}, {pipeline_mode = #tpu.pipeline_mode<synchronous>, transform_indices = @transform_5, window_bounds = array<i64: 128, 128>}, {pipeline_mode = #tpu.pipeline_mode<synchronous>, transform_indices = @transform_6, window_bounds = array<i64: 1, 128>}, {transform_indices = @transform_7, window_bounds = array<i64: 8, 128>}]} {
    %c0 = arith.constant 0 : index
    %c0_0 = arith.constant 0 : index
    %0 = vector.load %arg1[%c0, %c0_0] : memref<8x16xf32, #tpu.memory_space<vmem>>, vector<8x16xf32>
    %c0_1 = arith.constant 0 : index
    %c0_2 = arith.constant 0 : index
    %1 = vector.load %arg2[%c0_1, %c0_2] : memref<16x128xf32, #tpu.memory_space<vmem>>, vector<16x128xf32>
    %c0_3 = arith.constant 0 : index
    %c0_4 = arith.constant 0 : index
    %2 = vector.load %arg3[%c0_3, %c0_4] : memref<1x128xf32, #tpu.memory_space<vmem>>, vector<1x128xf32>
    %cst = arith.constant dense<0.000000e+00> : vector<8x128xf32>
    %3 = tpu.matmul %0, %1, %cst {dimension_numbers = #tpu.dot_dimension_numbers<[1], [0], [0], [1], [0, 0, 1, 1], [], []>} : vector<8x16xf32>, vector<16x128xf32>, vector<8x128xf32> -> vector<8x128xf32>
    %4 = vector.broadcast %2 : vector<1x128xf32> to vector<8x128xf32>
    %5 = arith.addf %3, %4 : vector<8x128xf32>
    %cst_5 = arith.constant 0.000000e+00 : f32
    %6 = vector.broadcast %cst_5 : f32 to vector<8x128xf32>
    %7 = arith.maximumf %5, %6 : vector<8x128xf32>
    %c0_6 = arith.constant 0 : index
    %c0_7 = arith.constant 0 : index
    %8 = vector.load %arg4[%c0_6, %c0_7] : memref<128x128xf32, #tpu.memory_space<vmem>>, vector<128x128xf32>
    %c0_8 = arith.constant 0 : index
    %c0_9 = arith.constant 0 : index
    %9 = vector.load %arg5[%c0_8, %c0_9] : memref<1x128xf32, #tpu.memory_space<vmem>>, vector<1x128xf32>
    %cst_10 = arith.constant dense<0.000000e+00> : vector<8x128xf32>
    %10 = tpu.matmul %7, %8, %cst_10 {dimension_numbers = #tpu.dot_dimension_numbers<[1], [0], [0], [1], [0, 0, 1, 1], [], []>} : vector<8x128xf32>, vector<128x128xf32>, vector<8x128xf32> -> vector<8x128xf32>
    %11 = vector.broadcast %9 : vector<1x128xf32> to vector<8x128xf32>
    %12 = arith.addf %10, %11 : vector<8x128xf32>
    %cst_11 = arith.constant 0.000000e+00 : f32
    %13 = vector.broadcast %cst_11 : f32 to vector<8x128xf32>
    %14 = arith.maximumf %12, %13 : vector<8x128xf32>
    %c0_12 = arith.constant 0 : index
    %c0_13 = arith.constant 0 : index
    %15 = vector.load %arg6[%c0_12, %c0_13] : memref<128x128xf32, #tpu.memory_space<vmem>>, vector<128x128xf32>
    %c0_14 = arith.constant 0 : index
    %c0_15 = arith.constant 0 : index
    %16 = vector.load %arg7[%c0_14, %c0_15] : memref<1x128xf32, #tpu.memory_space<vmem>>, vector<1x128xf32>
    %cst_16 = arith.constant dense<0.000000e+00> : vector<8x128xf32>
    %17 = tpu.matmul %14, %15, %cst_16 {dimension_numbers = #tpu.dot_dimension_numbers<[1], [0], [0], [1], [0, 0, 1, 1], [], []>} : vector<8x128xf32>, vector<128x128xf32>, vector<8x128xf32> -> vector<8x128xf32>
    %18 = vector.broadcast %16 : vector<1x128xf32> to vector<8x128xf32>
    %19 = arith.addf %17, %18 : vector<8x128xf32>
    %c0_17 = arith.constant 0 : index
    %c0_18 = arith.constant 0 : index
    %20 = vector.load %arg8[%c0_17, %c0_18] : memref<8x128xf32, #tpu.memory_space<vmem>>, vector<8x128xf32>
    tpu.vector_store %arg8[%c0_17, %c0_18], %19 {strides = array<i32>} : memref<8x128xf32, #tpu.memory_space<vmem>>, vector<8x128xf32>,
    return
  }
  func.func @transform_0(%arg0: i32) -> (i32, i32) {
    %c0_i32 = arith.constant 0 : i32
    %c0_i32_0 = arith.constant 0 : i32
    return %arg0, %c0_i32 : i32, i32
  }
  func.func @transform_1(%arg0: i32) -> (i32, i32) {
    %c0_i32 = arith.constant 0 : i32
    %c0_i32_0 = arith.constant 0 : i32
    %c0_i32_1 = arith.constant 0 : i32
    return %c0_i32, %c0_i32_0 : i32, i32
  }
  func.func @transform_2(%arg0: i32) -> (i32, i32) {
    %c0_i32 = arith.constant 0 : i32
    %c0_i32_0 = arith.constant 0 : i32
    %c0_i32_1 = arith.constant 0 : i32
    return %c0_i32, %c0_i32_0 : i32, i32
  }
  func.func @transform_3(%arg0: i32) -> (i32, i32) {
    %c0_i32 = arith.constant 0 : i32
    %c0_i32_0 = arith.constant 0 : i32
    %c0_i32_1 = arith.constant 0 : i32
    return %c0_i32, %c0_i32_0 : i32, i32
  }
  func.func @transform_4(%arg0: i32) -> (i32, i32) {
    %c0_i32 = arith.constant 0 : i32
    %c0_i32_0 = arith.constant 0 : i32
    %c0_i32_1 = arith.constant 0 : i32
    return %c0_i32, %c0_i32_0 : i32, i32
  }
  func.func @transform_5(%arg0: i32) -> (i32, i32) {
    %c0_i32 = arith.constant 0 : i32
    %c0_i32_0 = arith.constant 0 : i32
    %c0_i32_1 = arith.constant 0 : i32
    return %c0_i32, %c0_i32_0 : i32, i32
  }
  func.func @transform_6(%arg0: i32) -> (i32, i32) {
    %c0_i32 = arith.constant 0 : i32
    %c0_i32_0 = arith.constant 0 : i32
    %c0_i32_1 = arith.constant 0 : i32
    return %c0_i32, %c0_i32_0 : i32, i32
  }
  func.func @transform_7(%arg0: i32) -> (i32, i32) {
    %c0_i32 = arith.constant 0 : i32
    %c0_i32_0 = arith.constant 0 : i32
    return %arg0, %c0_i32 : i32, i32
  }
}

module attributes {stable_mosaic.version = 11 : i64} {
  func.func @_mlp_kernel(%arg0: i32, %arg1: memref<8x16xf32, #tpu.memory_space<vmem>>, %arg2: memref<16x128xf32, #tpu.memory_space<vmem>>, %arg3: memref<1x128xf32, #tpu.memory_space<vmem>>, %arg4: memref<128x128xf32, #tpu.memory_space<vmem>>, %arg5: memref<1x128xf32, #tpu.memory_space<vmem>>, %arg6: memref<128x128xf32, #tpu.memory_space<vmem>>, %arg7: memref<1x128xf32, #tpu.memory_space<vmem>>, %arg8: memref<8x128xf32, #tpu.memory_space<vmem>>) attributes {dimension_semantics = [#tpu.dimension_semantics<parallel>], iteration_bounds = array<i64: 1>, scalar_prefetch = 0 : i64, scratch_operands = 0 : i64, tpu.core_type = #tpu.core_type<tc>, window_params = [{transform_indices = @transform_0, window_bounds = array<i64: 8, 16>}, {pipeline_mode = #tpu.pipeline_mode<synchronous>, transform_indices = @transform_1, window_bounds = array<i64: 16, 128>}, {pipeline_mode = #tpu.pipeline_mode<synchronous>, transform_indices = @transform_2, window_bounds = array<i64: 1, 128>}, {pipeline_mode = #tpu.pipeline_mode<synchronous>, transform_indices = @transform_3, window_bounds = array<i64: 128, 128>}, {pipeline_mode = #tpu.pipeline_mode<synchronous>, transform_indices = @transform_4, window_bounds = array<i64: 1, 128>}, {pipeline_mode = #tpu.pipeline_mode<synchronous>, transform_indices = @transform_5, window_bounds = array<i64: 128, 128>}, {pipeline_mode = #tpu.pipeline_mode<synchronous>, transform_indices = @transform_6, window_bounds = array<i64: 1, 128>}, {transform_indices = @transform_7, window_bounds = array<i64: 8, 128>}]} {
    %c0 = arith.constant 0 : index
    %c0_0 = arith.constant 0 : index
    %0 = vector.load %arg1[%c0, %c0_0] : memref<8x16xf32, #tpu.memory_space<vmem>>, vector<8x16xf32>
    %c0_1 = arith.constant 0 : index
    %c0_2 = arith.constant 0 : index
    %1 = vector.load %arg2[%c0_1, %c0_2] : memref<16x128xf32, #tpu.memory_space<vmem>>, vector<16x128xf32>
    %c0_3 = arith.constant 0 : index
    %c0_4 = arith.constant 0 : index
    %2 = vector.load %arg3[%c0_3, %c0_4] : memref<1x128xf32, #tpu.memory_space<vmem>>, vector<1x128xf32>
    %cst = arith.constant dense<0.000000e+00> : vector<8x128xf32>
    %3 = tpu.matmul %0, %1, %cst {dimension_numbers = #tpu.dot_dimension_numbers<[1], [0], [0], [1], [0, 0, 1, 1], [], []>} : vector<8x16xf32>, vector<16x128xf32>, vector<8x128xf32> -> vector<8x128xf32>
    %4 = vector.broadcast %2 : vector<1x128xf32> to vector<8x128xf32>
    %5 = arith.addf %3, %4 : vector<8x128xf32>
    %cst_5 = arith.constant 0.000000e+00 : f32
    %6 = vector.broadcast %cst_5 : f32 to vector<8x128xf32>
    %7 = arith.maximumf %5, %6 : vector<8x128xf32>
    %c0_6 = arith.constant 0 : index
    %c0_7 = arith.constant 0 : index
    %8 = vector.load %arg4[%c0_6, %c0_7] : memref<128x128xf32, #tpu.memory_space<vmem>>, vector<128x128xf32>
    %c0_8 = arith.constant 0 : index
    %c0_9 = arith.constant 0 : index
    %9 = vector.load %arg5[%c0_8, %c0_9] : memref<1x128xf32, #tpu.memory_space<vmem>>, vector<1x128xf32>
    %cst_10 = arith.constant dense<0.000000e+00> : vector<8x128xf32>
    %10 = tpu.matmul %7, %8, %cst_10 {dimension_numbers = #tpu.dot_dimension_numbers<[1], [0], [0], [1], [0, 0, 1, 1], [], []>} : vector<8x128xf32>, vector<128x128xf32>, vector<8x128xf32> -> vector<8x128xf32>
    %11 = vector.broadcast %9 : vector<1x128xf32> to vector<8x128xf32>
    %12 = arith.addf %10, %11 : vector<8x128xf32>
    %cst_11 = arith.constant 0.000000e+00 : f32
    %13 = vector.broadcast %cst_11 : f32 to vector<8x128xf32>
    %14 = arith.maximumf %12, %13 : vector<8x128xf32>
    %c0_12 = arith.constant 0 : index
    %c0_13 = arith.constant 0 : index
    %15 = vector.load %arg6[%c0_12, %c0_13] : memref<128x128xf32, #tpu.memory_space<vmem>>, vector<128x128xf32>
    %c0_14 = arith.constant 0 : index
    %c0_15 = arith.constant 0 : index
    %16 = vector.load %arg7[%c0_14, %c0_15] : memref<1x128xf32, #tpu.memory_space<vmem>>, vector<1x128xf32>
    %cst_16 = arith.constant dense<0.000000e+00> : vector<8x128xf32>
    %17 = tpu.matmul %14, %15, %cst_16 {dimension_numbers = #tpu.dot_dimension_numbers<[1], [0], [0], [1], [0, 0, 1, 1], [], []>} : vector<8x128xf32>, vector<128x128xf32>, vector<8x128xf32> -> vector<8x128xf32>
    %18 = vector.broadcast %16 : vector<1x128xf32> to vector<8x128xf32>
    %19 = arith.addf %17, %18 : vector<8x128xf32>
    %c0_17 = arith.constant 0 : index
    %c0_18 = arith.constant 0 : index
    %20 = vector.load %arg8[%c0_17, %c0_18] : memref<8x128xf32, #tpu.memory_space<vmem>>, vector<8x128xf32>
    tpu.vector_store %arg8[%c0_17, %c0_18], %19 {strides = array<i32>} : memref<8x128xf32, #tpu.memory_space<vmem>>, vector<8x128xf32>,
    return
  }
  func.func @transform_0(%arg0: i32) -> (i32, i32) {
    %c0_i32 = arith.constant 0 : i32
    %c0_i32_0 = arith.constant 0 : i32
    return %arg0, %c0_i32 : i32, i32
  }
  func.func @transform_1(%arg0: i32) -> (i32, i32) {
    %c0_i32 = arith.constant 0 : i32
    %c0_i32_0 = arith.constant 0 : i32
    %c0_i32_1 = arith.constant 0 : i32
    return %c0_i32, %c0_i32_0 : i32, i32
  }
  func.func @transform_2(%arg0: i32) -> (i32, i32) {
    %c0_i32 = arith.constant 0 : i32
    %c0_i32_0 = arith.constant 0 : i32
    %c0_i32_1 = arith.constant 0 : i32
    return %c0_i32, %c0_i32_0 : i32, i32
  }
  func.func @transform_3(%arg0: i32) -> (i32, i32) {
    %c0_i32 = arith.constant 0 : i32
    %c0_i32_0 = arith.constant 0 : i32
    %c0_i32_1 = arith.constant 0 : i32
    return %c0_i32, %c0_i32_0 : i32, i32
  }
  func.func @transform_4(%arg0: i32) -> (i32, i32) {
    %c0_i32 = arith.constant 0 : i32
    %c0_i32_0 = arith.constant 0 : i32
    %c0_i32_1 = arith.constant 0 : i32
    return %c0_i32, %c0_i32_0 : i32, i32
  }
  func.func @transform_5(%arg0: i32) -> (i32, i32) {
    %c0_i32 = arith.constant 0 : i32
    %c0_i32_0 = arith.constant 0 : i32
    %c0_i32_1 = arith.constant 0 : i32
    return %c0_i32, %c0_i32_0 : i32, i32
  }
  func.func @transform_6(%arg0: i32) -> (i32, i32) {
    %c0_i32 = arith.constant 0 : i32
    %c0_i32_0 = arith.constant 0 : i32
    %c0_i32_1 = arith.constant 0 : i32
    return %c0_i32, %c0_i32_0 : i32, i32
  }
  func.func @transform_7(%arg0: i32) -> (i32, i32) {
    %c0_i32 = arith.constant 0 : i32
    %c0_i32_0 = arith.constant 0 : i32
    return %arg0, %c0_i32 : i32, i32
  }
}

</mosaic_0001>

<bundles_post_ra>
// kernel: tpu_custom_call.1
= control target key start
LH: loop header
LB: loop body
LE: loop exit
PB: predicated region body
PF: predicated region fallthrough
CT: control target
= control target key end

     0   :  { %12 = vsyncpa [#allocation3], 0  ;;  %s431_s0 = inlined_call_operand.hbm [shape: f32[8,16], index: 0, kind: input, shape index: {}]   ;;  %s432_s1 = inlined_call_operand.hbm [shape: f32[16,128], index: 1, kind: input, shape index: {}]   ;;  %s433_s2 = inlined_call_operand.vmem [shape: f32[1,128], index: 2, kind: input, shape index: {}]   ;;  %s434_s3 = inlined_call_operand.hbm [shape: f32[128,128], index: 3, kind: input, shape index: {}]   ;;  %s435_s4 = inlined_call_operand.vmem [shape: f32[1,128], index: 4, kind: input, shape index: {}]   ;;  %s436_s5 = inlined_call_operand.hbm [shape: f32[128,128], index: 5, kind: input, shape index: {}]   ;;  %s437_s6 = inlined_call_operand.vmem [shape: f32[1,128], index: 6, kind: input, shape index: {}]   ;;  %s438_s7 = inlined_call_operand.hbm [shape: f32[8,128], index: 7, kind: output, shape index: {}]  }
   0x1   :  { %13 = vsyncpa [#allocation6], 0 }
   0x2   :  { %14 = vsyncpa [#allocation9], 0  ;;  %s31_s26 = sshll.u32 %s432_s1, 4  ;;  %s32_s26 = int_to_ptr.hbm [resolvable:$true] %s31_s26 }
   0x3   :  { %15 = vsyncpa [#allocation4], 0  ;;  %s360_s27 = smov [#allocation5]   ;;  %s21_s8 = sshll.u32 %s431_s0, 4  ;;  %s22_s8 = int_to_ptr.hbm [resolvable:$true] %s21_s8 }
   0x4   :  { %s33_s28 = sshll.u32 %s360_s27, 4  ;;  %s361_s9 = smov 128   ;;  %s34_s28 = int_to_ptr.vmem [resolvable:$true] %s33_s28 }
   0x5   :  { %s362_s10 = smov 8   ;;  %s363_s11 = smov [#allocation2]  }
   0x6   :  { %39 = dma.hbm_to_vmem [thread:$0]  %s32_s26, 256, %s34_s28, [#allocation6], %s361_s9, %s361_s9, %s362_s10  }
   0x7   :  { %s23_s12 = sshll.u32 %s363_s11, 4  ;;  %s46_s15 = sshll.u32 %s434_s3, 4  ;;  %s24_s12 = int_to_ptr.vmem [resolvable:$true] %s23_s12  ;;  %s47_s15 = int_to_ptr.hbm [resolvable:$true] %s46_s15 }
   0x8   :  { %26 = dma.hbm_to_vmem [thread:$0]  %s22_s8, 128, %s24_s12, [#allocation3]  }
   0x9   :  { %s61_s17 = sshll.u32 %s436_s5, 4  ;;  %s364_s18 = smov [#allocation7]   ;;  %s62_s17 = int_to_ptr.hbm [resolvable:$true] %s61_s17 }
   0xa   :  { %s48_s19 = sshll.u32 %s364_s18, 4  ;;  %s365_s0 = smov [#allocation8]   ;;  %s49_s19 = int_to_ptr.vmem [resolvable:$true] %s48_s19 }
   0xb   :  { %54 = dma.hbm_to_vmem [thread:$0]  %s47_s15, 2048, %s49_s19, [#allocation6], %s361_s9, %s361_s9, %s362_s10  }
   0xc   :  { %s63_s20 = sshll.u32 %s365_s0, 4  ;;  %s64_s20 = int_to_ptr.vmem [resolvable:$true] %s63_s20 }
   0xd   :  { %69 = dma.hbm_to_vmem [thread:$0]  %s62_s17, 2048, %s64_s20, [#allocation9], %s361_s9, %s361_s9, %s362_s10  }
   0xe   :  { %352 = dma.done.wait [#allocation3], 128  }
   0xf   :  { %353 = vsyncadd [#allocation3], 4294967168 }
  0x10   :  { %354 = dma.done.wait [#allocation6], 2304  }
  0x11   :  { %355 = vsyncadd [#allocation6], 4294964992 }
  0x12   :  { %356 = dma.done.wait [#allocation9], 2048  }
  0x13   :  { %357 = vsyncadd [#allocation9], 4294965248  ;;  %v90_v0 = vld [vmem:[#allocation5 + $0x8] sm:$0xff]  ;;  %v89_v1 = vld [vmem:[#allocation5] sm:$0xff]  ;;  %vm95_vm0 = vcmask 130048   ;;  %s366_s24 = smov [#allocation10]  }
  0x14   :  { %113 = vmatpush.msra.mxu0 %v90_v0  ;;  %v88_v2 = vld [vmem:[#allocation2] sm:$0xff]  ;;  %v135_v3 = vld [vmem:[#allocation7 + $0x78] sm:$0xff]  ;;  %v134_v4 = vld [vmem:[#allocation7 + $0x70] sm:$0xff]  ;;  %s207_s25 = sshll.u32 %s366_s24, 4  ;;  %s209_s28 = sshll.u32 %s438_s7, 4  ;;  %s208_s25 = int_to_ptr.vmem [resolvable:$true] %s207_s25  ;;  %s210_s28 = int_to_ptr.hbm [resolvable:$true] %s209_s28 }
  0x15   :  { %140 = vmatpush.msra.mxu1 %v135_v3  ;;  %v133_v5 = vld [vmem:[#allocation7 + $0x68] sm:$0xff]  ;;  %v132_v6 = vld [vmem:[#allocation7 + $0x60] sm:$0xff]  ;;  %v131_v7 = vld [vmem:[#allocation7 + $0x58] sm:$0xff] }
  0x16   :  { %114 = vmatpush.msra.mxu0 %v89_v1  ;;  %v130_v8 = vld [vmem:[#allocation7 + $0x50] sm:$0xff]  ;;  %v129_v9 = vld [vmem:[#allocation7 + $0x48] sm:$0xff]  ;;  %v128_v10 = vld [vmem:[#allocation7 + $0x40] sm:$0xff] }
  0x17   :  { %221 = vmatmul.msk.f32.vlgmr.msra.gmra.mxu0 %vm95_vm0, %v88_v2  ;;  %141 = vmatpush.msra.mxu1 %v134_v4  ;;  %v127_v11 = vld [vmem:[#allocation7 + $0x38] sm:$0xff]  ;;  %v126_v12 = vld [vmem:[#allocation7 + $0x30] sm:$0xff]  ;;  %v125_v13 = vld [vmem:[#allocation7 + $0x28] sm:$0xff] }
  0x18   :  { %v124_v14 = vld [vmem:[#allocation7 + $0x20] sm:$0xff]  ;;  %v123_v15 = vld [vmem:[#allocation7 + $0x18] sm:$0xff]  ;;  %v122_v16 = vld [vmem:[#allocation7 + $0x10] sm:$0xff] }
  0x19   :  { %142 = vmatpush.msra.mxu1 %v133_v5  ;;  %v121_v17 = vld [vmem:[#allocation7 + $0x8] sm:$0xff]  ;;  %v120_v18 = vld [vmem:[#allocation7] sm:$0xff]  ;;  %v176_v19 = vld [vmem:[#allocation8 + $0x78] sm:$0xff] }
  0x1a   :  { %v175_v20 = vld [vmem:[#allocation8 + $0x70] sm:$0xff]  ;;  %181 = vmatpush.msra.mxu2 %v176_v19  ;;  %v174_v21 = vld [vmem:[#allocation8 + $0x68] sm:$0xff]  ;;  %v173_v22 = vld [vmem:[#allocation8 + $0x60] sm:$0xff] }
  0x1b   :  { %143 = vmatpush.msra.mxu1 %v132_v6  ;;  %v172_v23 = vld [vmem:[#allocation8 + $0x58] sm:$0xff]  ;;  %v171_v24 = vld [vmem:[#allocation8 + $0x50] sm:$0xff]  ;;  %v170_v25 = vld [vmem:[#allocation8 + $0x48] sm:$0xff] }
  0x1c   :  { %182 = vmatpush.msra.mxu2 %v175_v20  ;;  %v169_v26 = vld [vmem:[#allocation8 + $0x40] sm:$0xff]  ;;  %v168_v27 = vld [vmem:[#allocation8 + $0x38] sm:$0xff]  ;;  %v167_v28 = vld [vmem:[#allocation8 + $0x30] sm:$0xff] }
  0x1d   :  { %144 = vmatpush.msra.mxu1 %v131_v7  ;;  %v166_v29 = vld [vmem:[#allocation8 + $0x28] sm:$0xff]  ;;  %v165_v30 = vld [vmem:[#allocation8 + $0x20] sm:$0xff]  ;;  %v164_v31 = vld [vmem:[#allocation8 + $0x18] sm:$0xff] }
  0x1e   :  { %183 = vmatpush.msra.mxu2 %v174_v21  ;;  %v229_v32 = vld [vmem:[%s433_s2] ss:$0 sm:$0xff]  ;;  %v163_v36 = vld [vmem:[#allocation8 + $0x10] sm:$0xff]  ;;  %v161_v38 = vld [vmem:[#allocation8] sm:$0xff] }
  0x1f   :  { %145 = vmatpush.msra.mxu1 %v130_v8  ;;  %v162_v37 = vld [vmem:[#allocation8 + $0x8] sm:$0xff] }
  0x20   :  { %184 = vmatpush.msra.mxu2 %v173_v22  ;;  %v230_v39 = vld [vmem:[%s435_s4] ss:$0 sm:$0xff] }
  0x21   :  { %146 = vmatpush.msra.mxu1 %v129_v9  ;;  %v231_v43 = vld [vmem:[%s437_s6] ss:$0 sm:$0xff] }
  0x22   :  { %185 = vmatpush.msra.mxu2 %v172_v23 }
  0x23   :  { %147 = vmatpush.msra.mxu1 %v128_v10 }
  0x24   :  { %186 = vmatpush.msra.mxu2 %v171_v24 }
  0x25   :  { %148 = vmatpush.msra.mxu1 %v127_v11 }
  0x26   :  { %187 = vmatpush.msra.mxu2 %v170_v25 }
  0x27   :  { %149 = vmatpush.msra.mxu1 %v126_v12 }
  0x28   :  { %188 = vmatpush.msra.mxu2 %v169_v26 }
  0x29   :  { %150 = vmatpush.msra.mxu1 %v125_v13 }
  0x2a   :  { %189 = vmatpush.msra.mxu2 %v168_v27 }
  0x2b   :  { %151 = vmatpush.msra.mxu1 %v124_v14 }
  0x2c   :  { %190 = vmatpush.msra.mxu2 %v167_v28 }
  0x2d   :  { %152 = vmatpush.msra.mxu1 %v123_v15 }
  0x2e   :  { %191 = vmatpush.msra.mxu2 %v166_v29 }
  0x2f   :  { %153 = vmatpush.msra.mxu1 %v122_v16 }
  0x30   :  { %192 = vmatpush.msra.mxu2 %v165_v30 }
  0x31   :  { %154 = vmatpush.msra.mxu1 %v121_v17 }
  0x32   :  { %193 = vmatpush.msra.mxu2 %v164_v31 }
  0x33   :  { %155 = vmatpush.msra.mxu1 %v120_v18 }
  0x34   :  { %194 = vmatpush.msra.mxu2 %v163_v36 }
  0x36   :  { %195 = vmatpush.msra.mxu2 %v162_v37 }
  0x38   :  { %196 = vmatpush.msra.mxu2 %v161_v38 }
  0x94   :  { %v116_v33 = vpop.f32.mrf.mxu0 }
  0x95   :  { %v117_v34 = vadd.f32 %v229_v32, %v116_v33 }
  0x97   :  { %v119_v35 = vmax.f32 %v117_v34, 0.0 }
  0x99   :  { %156 = vmatmul.f32.vlgmr.msra.gmra.mxu1 %v119_v35 }
 0x116   :  { %v157_v40 = vpop.f32.mrf.mxu1 }
 0x117   :  { %v158_v41 = vadd.f32 %v230_v39, %v157_v40 }
 0x119   :  { %v160_v42 = vmax.f32 %v158_v41, 0.0 }
 0x11b   :  { %197 = vmatmul.f32.vlgmr.msra.gmra.mxu2 %v160_v42 }
 0x19e   :  { %v198_v44 = vpop.f32.mrf.mxu2 }
 0x19f   :  { %v199_v45 = vadd.f32 %v231_v43, %v198_v44 }
 0x1a1   :  { %201 = vst [vmem:[#allocation10] sm:$0xff] %v199_v45 }
 0x1a2   :  { %212 = dma.vmem_to_hbm [thread:$0]  %s208_s25, 128, %s210_s28, [#allocation4]  }
 0x1a3   :  { %358 = dma.done.wait [#allocation4], 128  }
 0x1a4   :  { %359 = vsyncadd [#allocation4], 4294967168 }
 0x1a5   :  { %217 = vsyncpa [#allocation3], 1 }
 0x1a6   :  { %218 = vsyncpa [#allocation6], 1 }
 0x1a7   :  { %219 = vsyncpa [#allocation9], 1 }
 0x1a8   :  { %220 = vsyncpa [#allocation4], 1 }

// kernel: tpu_custom_call.1
= control target key start
LH: loop header
LB: loop body
LE: loop exit
PB: predicated region body
PF: predicated region fallthrough
CT: control target
= control target key end

     0   :  { %12 = vsyncpa [#allocation3], 0  ;;  %s431_s0 = inlined_call_operand.hbm [shape: f32[8,16], index: 0, kind: input, shape index: {}]   ;;  %s432_s1 = inlined_call_operand.hbm [shape: f32[16,128], index: 1, kind: input, shape index: {}]   ;;  %s433_s2 = inlined_call_operand.vmem [shape: f32[1,128], index: 2, kind: input, shape index: {}]   ;;  %s434_s3 = inlined_call_operand.hbm [shape: f32[128,128], index: 3, kind: input, shape index: {}]   ;;  %s435_s4 = inlined_call_operand.vmem [shape: f32[1,128], index: 4, kind: input, shape index: {}]   ;;  %s436_s5 = inlined_call_operand.hbm [shape: f32[128,128], index: 5, kind: input, shape index: {}]   ;;  %s437_s6 = inlined_call_operand.vmem [shape: f32[1,128], index: 6, kind: input, shape index: {}]   ;;  %s438_s7 = inlined_call_operand.hbm [shape: f32[8,128], index: 7, kind: output, shape index: {}]  }
   0x1   :  { %13 = vsyncpa [#allocation6], 0 }
   0x2   :  { %14 = vsyncpa [#allocation9], 0  ;;  %s31_s26 = sshll.u32 %s432_s1, 4  ;;  %s32_s26 = int_to_ptr.hbm [resolvable:$true] %s31_s26 }
   0x3   :  { %15 = vsyncpa [#allocation4], 0  ;;  %s360_s27 = smov [#allocation5]   ;;  %s21_s8 = sshll.u32 %s431_s0, 4  ;;  %s22_s8 = int_to_ptr.hbm [resolvable:$true] %s21_s8 }
   0x4   :  { %s33_s28 = sshll.u32 %s360_s27, 4  ;;  %s361_s9 = smov 128   ;;  %s34_s28 = int_to_ptr.vmem [resolvable:$true] %s33_s28 }
   0x5   :  { %s362_s10 = smov 8   ;;  %s363_s11 = smov [#allocation2]  }
   0x6   :  { %39 = dma.hbm_to_vmem [thread:$0]  %s32_s26, 256, %s34_s28, [#allocation6], %s361_s9, %s361_s9, %s362_s10  }
   0x7   :  { %s23_s12 = sshll.u32 %s363_s11, 4  ;;  %s46_s15 = sshll.u32 %s434_s3, 4  ;;  %s24_s12 = int_to_ptr.vmem [resolvable:$true] %s23_s12  ;;  %s47_s15 = int_to_ptr.hbm [resolvable:$true] %s46_s15 }
   0x8   :  { %26 = dma.hbm_to_vmem [thread:$0]  %s22_s8, 128, %s24_s12, [#allocation3]  }
   0x9   :  { %s61_s17 = sshll.u32 %s436_s5, 4  ;;  %s364_s18 = smov [#allocation7]   ;;  %s62_s17 = int_to_ptr.hbm [resolvable:$true] %s61_s17 }
   0xa   :  { %s48_s19 = sshll.u32 %s364_s18, 4  ;;  %s365_s0 = smov [#allocation8]   ;;  %s49_s19 = int_to_ptr.vmem [resolvable:$true] %s48_s19 }
   0xb   :  { %54 = dma.hbm_to_vmem [thread:$0]  %s47_s15, 2048, %s49_s19, [#allocation6], %s361_s9, %s361_s9, %s362_s10  }
   0xc   :  { %s63_s20 = sshll.u32 %s365_s0, 4  ;;  %s64_s20 = int_to_ptr.vmem [resolvable:$true] %s63_s20 }
   0xd   :  { %69 = dma.hbm_to_vmem [thread:$0]  %s62_s17, 2048, %s64_s20, [#allocation9], %s361_s9, %s361_s9, %s362_s10  }
   0xe   :  { %352 = dma.done.wait [#allocation3], 128  }
   0xf   :  { %353 = vsyncadd [#allocation3], 4294967168 }
  0x10   :  { %354 = dma.done.wait [#allocation6], 2304  }
  0x11   :  { %355 = vsyncadd [#allocation6], 4294964992 }
  0x12   :  { %356 = dma.done.wait [#allocation9], 2048  }
  0x13   :  { %357 = vsyncadd [#allocation9], 4294965248  ;;  %v90_v0 = vld [vmem:[#allocation5 + $0x8] sm:$0xff]  ;;  %v89_v1 = vld [vmem:[#allocation5] sm:$0xff]  ;;  %vm95_vm0 = vcmask 130048   ;;  %s366_s24 = smov [#allocation10]  }
  0x14   :  { %113 = vmatpush.msra.mxu0 %v90_v0  ;;  %v88_v2 = vld [vmem:[#allocation2] sm:$0xff]  ;;  %v135_v3 = vld [vmem:[#allocation7 + $0x78] sm:$0xff]  ;;  %v134_v4 = vld [vmem:[#allocation7 + $0x70] sm:$0xff]  ;;  %s207_s25 = sshll.u32 %s366_s24, 4  ;;  %s209_s28 = sshll.u32 %s438_s7, 4  ;;  %s208_s25 = int_to_ptr.vmem [resolvable:$true] %s207_s25  ;;  %s210_s28 = int_to_ptr.hbm [resolvable:$true] %s209_s28 }
  0x15   :  { %140 = vmatpush.msra.mxu1 %v135_v3  ;;  %v133_v5 = vld [vmem:[#allocation7 + $0x68] sm:$0xff]  ;;  %v132_v6 = vld [vmem:[#allocation7 + $0x60] sm:$0xff]  ;;  %v131_v7 = vld [vmem:[#allocation7 + $0x58] sm:$0xff] }
  0x16   :  { %114 = vmatpush.msra.mxu0 %v89_v1  ;;  %v130_v8 = vld [vmem:[#allocation7 + $0x50] sm:$0xff]  ;;  %v129_v9 = vld [vmem:[#allocation7 + $0x48] sm:$0xff]  ;;  %v128_v10 = vld [vmem:[#allocation7 + $0x40] sm:$0xff] }
  0x17   :  { %221 = vmatmul.msk.f32.vlgmr.msra.gmra.mxu0 %vm95_vm0, %v88_v2  ;;  %141 = vmatpush.msra.mxu1 %v134_v4  ;;  %v127_v11 = vld [vmem:[#allocation7 + $0x38] sm:$0xff]  ;;  %v126_v12 = vld [vmem:[#allocation7 + $0x30] sm:$0xff]  ;;  %v125_v13 = vld [vmem:[#allocation7 + $0x28] sm:$0xff] }
  0x18   :  { %v124_v14 = vld [vmem:[#allocation7 + $0x20] sm:$0xff]  ;;  %v123_v15 = vld [vmem:[#allocation7 + $0x18] sm:$0xff]  ;;  %v122_v16 = vld [vmem:[#allocation7 + $0x10] sm:$0xff] }
  0x19   :  { %142 = vmatpush.msra.mxu1 %v133_v5  ;;  %v121_v17 = vld [vmem:[#allocation7 + $0x8] sm:$0xff]  ;;  %v120_v18 = vld [vmem:[#allocation7] sm:$0xff]  ;;  %v176_v19 = vld [vmem:[#allocation8 + $0x78] sm:$0xff] }
  0x1a   :  { %v175_v20 = vld [vmem:[#allocation8 + $0x70] sm:$0xff]  ;;  %181 = vmatpush.msra.mxu2 %v176_v19  ;;  %v174_v21 = vld [vmem:[#allocation8 + $0x68] sm:$0xff]  ;;  %v173_v22 = vld [vmem:[#allocation8 + $0x60] sm:$0xff] }
  0x1b   :  { %143 = vmatpush.msra.mxu1 %v132_v6  ;;  %v172_v23 = vld [vmem:[#allocation8 + $0x58] sm:$0xff]  ;;  %v171_v24 = vld [vmem:[#allocation8 + $0x50] sm:$0xff]  ;;  %v170_v25 = vld [vmem:[#allocation8 + $0x48] sm:$0xff] }
  0x1c   :  { %182 = vmatpush.msra.mxu2 %v175_v20  ;;  %v169_v26 = vld [vmem:[#allocation8 + $0x40] sm:$0xff]  ;;  %v168_v27 = vld [vmem:[#allocation8 + $0x38] sm:$0xff]  ;;  %v167_v28 = vld [vmem:[#allocation8 + $0x30] sm:$0xff] }
  0x1d   :  { %144 = vmatpush.msra.mxu1 %v131_v7  ;;  %v166_v29 = vld [vmem:[#allocation8 + $0x28] sm:$0xff]  ;;  %v165_v30 = vld [vmem:[#allocation8 + $0x20] sm:$0xff]  ;;  %v164_v31 = vld [vmem:[#allocation8 + $0x18] sm:$0xff] }
  0x1e   :  { %183 = vmatpush.msra.mxu2 %v174_v21  ;;  %v229_v32 = vld [vmem:[%s433_s2] ss:$0 sm:$0xff]  ;;  %v163_v36 = vld [vmem:[#allocation8 + $0x10] sm:$0xff]  ;;  %v161_v38 = vld [vmem:[#allocation8] sm:$0xff] }
  0x1f   :  { %145 = vmatpush.msra.mxu1 %v130_v8  ;;  %v162_v37 = vld [vmem:[#allocation8 + $0x8] sm:$0xff] }
  0x20   :  { %184 = vmatpush.msra.mxu2 %v173_v22  ;;  %v230_v39 = vld [vmem:[%s435_s4] ss:$0 sm:$0xff] }
  0x21   :  { %146 = vmatpush.msra.mxu1 %v129_v9  ;;  %v231_v43 = vld [vmem:[%s437_s6] ss:$0 sm:$0xff] }
  0x22   :  { %185 = vmatpush.msra.mxu2 %v172_v23 }
  0x23   :  { %147 = vmatpush.msra.mxu1 %v128_v10 }
  0x24   :  { %186 = vmatpush.msra.mxu2 %v171_v24 }
  0x25   :  { %148 = vmatpush.msra.mxu1 %v127_v11 }
  0x26   :  { %187 = vmatpush.msra.mxu2 %v170_v25 }
  0x27   :  { %149 = vmatpush.msra.mxu1 %v126_v12 }
  0x28   :  { %188 = vmatpush.msra.mxu2 %v169_v26 }
  0x29   :  { %150 = vmatpush.msra.mxu1 %v125_v13 }
  0x2a   :  { %189 = vmatpush.msra.mxu2 %v168_v27 }
  0x2b   :  { %151 = vmatpush.msra.mxu1 %v124_v14 }
  0x2c   :  { %190 = vmatpush.msra.mxu2 %v167_v28 }
  0x2d   :  { %152 = vmatpush.msra.mxu1 %v123_v15 }
  0x2e   :  { %191 = vmatpush.msra.mxu2 %v166_v29 }
  0x2f   :  { %153 = vmatpush.msra.mxu1 %v122_v16 }
  0x30   :  { %192 = vmatpush.msra.mxu2 %v165_v30 }
  0x31   :  { %154 = vmatpush.msra.mxu1 %v121_v17 }
  0x32   :  { %193 = vmatpush.msra.mxu2 %v164_v31 }
  0x33   :  { %155 = vmatpush.msra.mxu1 %v120_v18 }
  0x34   :  { %194 = vmatpush.msra.mxu2 %v163_v36 }
  0x36   :  { %195 = vmatpush.msra.mxu2 %v162_v37 }
  0x38   :  { %196 = vmatpush.msra.mxu2 %v161_v38 }
  0x94   :  { %v116_v33 = vpop.f32.mrf.mxu0 }
  0x95   :  { %v117_v34 = vadd.f32 %v229_v32, %v116_v33 }
  0x97   :  { %v119_v35 = vmax.f32 %v117_v34, 0.0 }
  0x99   :  { %156 = vmatmul.f32.vlgmr.msra.gmra.mxu1 %v119_v35 }
 0x116   :  { %v157_v40 = vpop.f32.mrf.mxu1 }
 0x117   :  { %v158_v41 = vadd.f32 %v230_v39, %v157_v40 }
 0x119   :  { %v160_v42 = vmax.f32 %v158_v41, 0.0 }
 0x11b   :  { %197 = vmatmul.f32.vlgmr.msra.gmra.mxu2 %v160_v42 }
 0x19e   :  { %v198_v44 = vpop.f32.mrf.mxu2 }
 0x19f   :  { %v199_v45 = vadd.f32 %v231_v43, %v198_v44 }
 0x1a1   :  { %201 = vst [vmem:[#allocation10] sm:$0xff] %v199_v45 }
 0x1a2   :  { %212 = dma.vmem_to_hbm [thread:$0]  %s208_s25, 128, %s210_s28, [#allocation4]  }
 0x1a3   :  { %358 = dma.done.wait [#allocation4], 128  }
 0x1a4   :  { %359 = vsyncadd [#allocation4], 4294967168 }
 0x1a5   :  { %217 = vsyncpa [#allocation3], 1 }
 0x1a6   :  { %218 = vsyncpa [#allocation6], 1 }
 0x1a7   :  { %219 = vsyncpa [#allocation9], 1 }
 0x1a8   :  { %220 = vsyncpa [#allocation4], 1 }

</bundles_post_ra>
